<compile_context>
chip_gen: v6e
topology: v6e:2x2x1
jax: 0.10.0
libtpu: 0.0.40
codegen_flags: <defaults>
</compile_context>

<pallas_src>
import functools
import math

import jax
import jax.numpy as jnp
from jax.experimental import pallas as pl
from jax.experimental.pallas import tpu as pltpu

_GELU_C = math.sqrt(math.pi / 2)  # the module's constant (not standard sqrt(2/pi))


def _round_up(x, m):
    return ((x + m - 1) // m) * m


def _gelu_f32(y):
    # module's gelu: 0.5*y*(1+tanh(sqrt(pi/2)*(y + 0.044715*y^3)))
    # polynomial rewritten as y*(1 + 0.044715*y*y) to save one VPU multiply.
    inner = y * (1.0 + 0.044715 * (y * y))
    return 0.5 * y * (1.0 + jnp.tanh(_GELU_C * inner))


def _conv_gelu_kernel(x_ref, w_ref, b_ref, o_ref, *, stride, tl, qcounts):
    """One (L-tile, C_out-tile) block of Conv1d + bias + tanh-GELU.

    x_ref: (1, stride, TLQ, C_in)  phase-decomposed input window (compute dtype)
    w_ref: (K, C_in, TN)           conv taps for this C_out tile (compute dtype)
    b_ref: (1, TN)                 bias tile (f32)
    o_ref: (1, TL, TN)             output tile
    """
    acc = None
    for r in range(stride):
        x_r = x_ref[0, r, :, :]                                # (TLQ, C_in)
        for q in range(qcounts[r]):
            k = q * stride + r                                 # original tap index
            part = jnp.dot(x_r[q:q + tl, :], w_ref[k, :, :],
                           preferred_element_type=jnp.float32)
            acc = part if acc is None else acc + part
    y = acc + b_ref[...]                                       # f32 epilogue
    o_ref[0] = _gelu_f32(y).astype(o_ref.dtype)


def conv1d_gelu_layer(x_blc, weight, bias, stride, padding, *,
                      compute_dtype=jnp.bfloat16, max_tl=512, max_tn=256):
    """One Encoder block: Conv1d + GELU.

    x_blc:  (B, L, C_in)      channels-last activation
    weight: (C_out, C_in, K)  PyTorch Conv1d weight layout
    bias:   (C_out,)
    """
    B, L, C_in = map(int, x_blc.shape)
    C_out, _, K = map(int, weight.shape)
    s, p = int(stride), int(padding)
    L_out = (L + 2 * p - K) // s + 1

    # ---- tiling choices ----
    TL = min(max_tl, _round_up(L_out, 8))          # output rows per tile (sublane aligned)
    nL = -(-L_out // TL)                           # number of L tiles
    C_out_p = _round_up(C_out, 128)                # lane-dense output channels
    TN = min(max_tn, C_out_p)
    C_out_p = _round_up(C_out_p, TN)
    nN = C_out_p // TN
    Q = -(-K // s)                                 # taps per stride-phase (max)
    TLQ = TL + Q - 1                               # window rows per phase (halo = Q-1)
    qcounts = tuple(max(0, -(-(K - r) // s)) for r in range(s))

    # ---- glue in plain JAX: pad, phase-decomposed overlapped windows ----
    xc = x_blc.astype(compute_dtype)
    L_ext = (nL * TL + Q) * s                      # covers all gathered rows
    pad_tail = L_ext - (L + 2 * p)
    xp = jnp.pad(xc, ((0, 0), (p, p + pad_tail), (0, 0)))

    # Xg[b, t, r, j, c] = xp[b, (t*TL + j)*s + r, c]
    t_idx = jnp.arange(nL)[:, None, None]
    r_idx = jnp.arange(s)[None, :, None]
    j_idx = jnp.arange(TLQ)[None, None, :]
    gather_idx = (t_idx * TL + j_idx) * s + r_idx                  # (nL, s, TLQ)
    xg = xp[:, gather_idx, :].reshape(B * nL, s, TLQ, C_in)        # (B*nL, s, TLQ, C_in)

    # weight (C_out, C_in, K) -> (K, C_in, C_out_p); bias -> (1, C_out_p) f32
    w_t = jnp.transpose(weight, (2, 1, 0)).astype(compute_dtype)
    w_t = jnp.pad(w_t, ((0, 0), (0, 0), (0, C_out_p - C_out)))
    b_row = jnp.pad(bias.astype(jnp.float32),
                    (0, C_out_p - C_out)).reshape(1, C_out_p)

    kernel = functools.partial(_conv_gelu_kernel, stride=s, tl=TL, qcounts=qcounts)

    out_p = pl.pallas_call(
        kernel,
        out_shape=jax.ShapeDtypeStruct((B * nL, TL, C_out_p), x_blc.dtype),
        grid_spec=pltpu.PrefetchScalarGridSpec(
            num_scalar_prefetch=0,
            # C_out-tile axis outer -> the weight block index is constant over
            # the inner (B*nL) axis, so the weight tile stays VMEM-resident.
            grid=(nN, B * nL),
            in_specs=[
                pl.BlockSpec((1, s, TLQ, C_in), lambda n, bt: (bt, 0, 0, 0)),
                pl.BlockSpec((K, C_in, TN),     lambda n, bt: (0, 0, n)),
                pl.BlockSpec((1, TN),           lambda n, bt: (0, n)),
            ],
            out_specs=pl.BlockSpec((1, TL, TN), lambda n, bt: (bt, 0, n)),
        ),
        compiler_params=pltpu.CompilerParams(
            dimension_semantics=("parallel", "parallel"),
            vmem_limit_bytes=40 * 1024 * 1024),   # headroom for v7x's 64 MiB VMEM
    )(xg, w_t, b_row)

    # strip L / C_out padding
    out = out_p.reshape(B, nL * TL, C_out_p)[:, :L_out, :C_out]
    return out


class EncoderPallas:
    """Mirror of the PyTorch Encoder: stack of Conv1d(+padding,+stride) -> GELU."""

    def __init__(self, input_dim, hidden, kernel_sizes, strides, padding, key):
        assert len(kernel_sizes) == len(strides) == len(padding), \
            "Inconsistent size of network parameters (kernels, strides and padding)"
        self.strides = strides
        self.padding = padding
        self.params = []
        in_dim = input_dim
        for k in kernel_sizes:
            key, wk, bk = jax.random.split(key, 3)
            bound = 1.0 / math.sqrt(in_dim * k)        # PyTorch Conv1d default init bound
            w = jax.random.uniform(wk, (hidden, in_dim, k), jnp.float32, -bound, bound)
            b = jax.random.uniform(bk, (hidden,), jnp.float32, -bound, bound)
            self.params.append((w, b))
            in_dim = hidden

    def __call__(self, x_ncl, compute_dtype=jnp.bfloat16):
        # input layout: NCL (like PyTorch Conv1d); convert to channels-last.
        z = jnp.transpose(x_ncl, (0, 2, 1))
        for (w, b), s, p in zip(self.params, self.strides, self.padding):
            z = conv1d_gelu_layer(z, w, b, s, p, compute_dtype=compute_dtype)
        return jnp.transpose(z, (0, 2, 1))             # back to NCL


def _reference_forward(x_ncl, params, strides, padding):
    """Pure-JAX reference (lax.conv) for a correctness check."""
    z = x_ncl
    for (w, b), s, p in zip(params, strides, padding):
        z = jax.lax.conv_general_dilated(
            z, w, window_strides=(s,), padding=[(p, p)],
            dimension_numbers=("NCH", "OIH", "NCH"),
            precision=jax.lax.Precision.HIGHEST)
        z = z + b[None, :, None]
        z = 0.5 * z * (1.0 + jnp.tanh(math.sqrt(math.pi / 2) * (z + 0.044715 * z ** 3)))
    return z


if __name__ == "__main__":
    key = jax.random.PRNGKey(0)
    k_x, k_p = jax.random.split(key)

    # small shapes consistent with the module's forward (Conv1d stack)
    B, C_in, L = 2, 4, 16
    hidden = 32
    kernel_sizes = [3, 3]
    strides = [2, 1]
    padding = [1, 1]

    x = jax.random.normal(k_x, (B, C_in, L), dtype=jnp.float32)   # NCL

    enc = EncoderPallas(C_in, hidden, kernel_sizes, strides, padding, k_p)
    z_ref = _reference_forward(x, enc.params, strides, padding)

    # optimized path: bf16 MXU inputs, f32 accumulation + f32 epilogue
    z_bf16 = jax.block_until_ready(enc(x, compute_dtype=jnp.bfloat16))
    assert not bool(jnp.isnan(z_bf16).any()), "NaN in Encoder.forward output"
    assert z_bf16.shape == z_ref.shape
    assert bool(jnp.allclose(z_bf16, z_ref, atol=2e-2, rtol=2e-2)), \
        "bf16 path mismatch vs reference"

    # full-f32 path: tight correctness check
    z_f32 = jax.block_until_ready(enc(x, compute_dtype=jnp.float32))
    assert not bool(jnp.isnan(z_f32).any()), "NaN in Encoder.forward output"
    assert z_f32.shape == z_ref.shape
    assert bool(jnp.allclose(z_f32, z_ref, atol=2e-3, rtol=2e-3)), \
        "f32 path mismatch vs reference"

    print("KERNEL_OK")
</pallas_src>

<mosaic_0001>
module attributes {stable_mosaic.version = 11 : i64} {
  func.func @_conv_gelu_kernel(%arg0: i32, %arg1: i32, %arg2: memref<1x2x9x4xbf16, #tpu.memory_space<vmem>>, %arg3: memref<3x4x128xbf16, #tpu.memory_space<vmem>>, %arg4: memref<1x128xf32, #tpu.memory_space<vmem>>, %arg5: memref<1x8x128xf32, #tpu.memory_space<vmem>>) attributes {dimension_semantics = [#tpu.dimension_semantics<parallel>, #tpu.dimension_semantics<parallel>], iteration_bounds = array<i64: 1, 2>, scalar_prefetch = 0 : i64, scratch_operands = 0 : i64, tpu.core_type = #tpu.core_type<tc>, window_params = [{transform_indices = @transform_0, window_bounds = array<i64: 1, 2, 9, 4>}, {transform_indices = @transform_1, window_bounds = array<i64: 3, 4, 128>}, {transform_indices = @transform_2, window_bounds = array<i64: 1, 128>}, {transform_indices = @transform_3, window_bounds = array<i64: 1, 8, 128>}]} {
    %c0 = arith.constant 0 : index
    %c0_0 = arith.constant 0 : index
    %c0_1 = arith.constant 0 : index
    %c0_2 = arith.constant 0 : index
    %0 = vector.load %arg2[%c0, %c0_0, %c0_1, %c0_2] : memref<1x2x9x4xbf16, #tpu.memory_space<vmem>>, vector<1x1x9x4xbf16>
    %1 = vector.shape_cast %0 : vector<1x1x9x4xbf16> to vector<9x4xbf16>
    %2 = vector.extract_strided_slice %1 {offsets = [0, 0], sizes = [8, 4], strides = [1, 1]} : vector<9x4xbf16> to vector<8x4xbf16>
    %c0_3 = arith.constant 0 : index
    %c0_4 = arith.constant 0 : index
    %c0_5 = arith.constant 0 : index
    %3 = vector.load %arg3[%c0_3, %c0_4, %c0_5] : memref<3x4x128xbf16, #tpu.memory_space<vmem>>, vector<1x4x128xbf16>
    %4 = vector.shape_cast %3 : vector<1x4x128xbf16> to vector<4x128xbf16>
    %cst = arith.constant dense<0.000000e+00> : vector<8x128xf32>
    %5 = tpu.matmul %2, %4, %cst {dimension_numbers = #tpu.dot_dimension_numbers<[1], [0], [0], [1], [0, 0, 1, 1], [], []>} : vector<8x4xbf16>, vector<4x128xbf16>, vector<8x128xf32> -> vector<8x128xf32>
    %6 = vector.extract_strided_slice %1 {offsets = [1, 0], sizes = [8, 4], strides = [1, 1]} : vector<9x4xbf16> to vector<8x4xbf16>
    %c2 = arith.constant 2 : index
    %c0_6 = arith.constant 0 : index
    %c0_7 = arith.constant 0 : index
    %7 = vector.load %arg3[%c2, %c0_6, %c0_7] : memref<3x4x128xbf16, #tpu.memory_space<vmem>>, vector<1x4x128xbf16>
    %8 = vector.shape_cast %7 : vector<1x4x128xbf16> to vector<4x128xbf16>
    %cst_8 = arith.constant dense<0.000000e+00> : vector<8x128xf32>
    %9 = tpu.matmul %6, %8, %cst_8 {dimension_numbers = #tpu.dot_dimension_numbers<[1], [0], [0], [1], [0, 0, 1, 1], [], []>} : vector<8x4xbf16>, vector<4x128xbf16>, vector<8x128xf32> -> vector<8x128xf32>
    %10 = arith.addf %5, %9 : vector<8x128xf32>
    %c0_9 = arith.constant 0 : index
    %c1 = arith.constant 1 : index
    %c0_10 = arith.constant 0 : index
    %c0_11 = arith.constant 0 : index
    %11 = vector.load %arg2[%c0_9, %c1, %c0_10, %c0_11] : memref<1x2x9x4xbf16, #tpu.memory_space<vmem>>, vector<1x1x9x4xbf16>
    %12 = vector.shape_cast %11 : vector<1x1x9x4xbf16> to vector<9x4xbf16>
    %13 = vector.extract_strided_slice %12 {offsets = [0, 0], sizes = [8, 4], strides = [1, 1]} : vector<9x4xbf16> to vector<8x4xbf16>
    %c1_12 = arith.constant 1 : index
    %c0_13 = arith.constant 0 : index
    %c0_14 = arith.constant 0 : index
    %14 = vector.load %arg3[%c1_12, %c0_13, %c0_14] : memref<3x4x128xbf16, #tpu.memory_space<vmem>>, vector<1x4x128xbf16>
    %15 = vector.shape_cast %14 : vector<1x4x128xbf16> to vector<4x128xbf16>
    %cst_15 = arith.constant dense<0.000000e+00> : vector<8x128xf32>
    %16 = tpu.matmul %13, %15, %cst_15 {dimension_numbers = #tpu.dot_dimension_numbers<[1], [0], [0], [1], [0, 0, 1, 1], [], []>} : vector<8x4xbf16>, vector<4x128xbf16>, vector<8x128xf32> -> vector<8x128xf32>
    %17 = arith.addf %10, %16 : vector<8x128xf32>
    %c0_16 = arith.constant 0 : index
    %c0_17 = arith.constant 0 : index
    %18 = vector.load %arg4[%c0_16, %c0_17] : memref<1x128xf32, #tpu.memory_space<vmem>>, vector<1x128xf32>
    %19 = vector.broadcast %18 : vector<1x128xf32> to vector<8x128xf32>
    %20 = arith.addf %17, %19 : vector<8x128xf32>
    %21 = arith.mulf %20, %20 : vector<8x128xf32>
    %cst_18 = arith.constant 4.471500e-02 : f32
    %22 = vector.broadcast %cst_18 : f32 to vector<8x128xf32>
    %23 = arith.mulf %22, %21 : vector<8x128xf32>
    %cst_19 = arith.constant 1.000000e+00 : f32
    %24 = vector.broadcast %cst_19 : f32 to vector<8x128xf32>
    %25 = arith.addf %24, %23 : vector<8x128xf32>
    %26 = arith.mulf %20, %25 : vector<8x128xf32>
    %cst_20 = arith.constant 5.000000e-01 : f32
    %27 = vector.broadcast %cst_20 : f32 to vector<8x128xf32>
    %28 = arith.mulf %27, %20 : vector<8x128xf32>
    %cst_21 = arith.constant 1.25331414 : f32
    %29 = vector.broadcast %cst_21 : f32 to vector<8x128xf32>
    %30 = arith.mulf %29, %26 : vector<8x128xf32>
    %31 = math.tanh %30 : vector<8x128xf32>
    %cst_22 = arith.constant 1.000000e+00 : f32
    %32 = vector.broadcast %cst_22 : f32 to vector<8x128xf32>
    %33 = arith.addf %32, %31 : vector<8x128xf32>
    %34 = arith.mulf %28, %33 : vector<8x128xf32>
    %c0_23 = arith.constant 0 : index
    %c0_24 = arith.constant 0 : index
    %c0_25 = arith.constant 0 : index
    %35 = vector.load %arg5[%c0_23, %c0_24, %c0_25] : memref<1x8x128xf32, #tpu.memory_space<vmem>>, vector<1x8x128xf32>
    %36 = vector.shape_cast %35 : vector<1x8x128xf32> to vector<8x128xf32>
    %37 = vector.shape_cast %34 : vector<8x128xf32> to vector<1x8x128xf32>
    tpu.vector_store %arg5[%c0_23, %c0_24, %c0_25], %37 {strides = array<i32>} : memref<1x8x128xf32, #tpu.memory_space<vmem>>, vector<1x8x128xf32>,
    return
  }
  func.func @transform_0(%arg0: i32, %arg1: i32) -> (i32, i32, i32, i32) {
    %c0_i32 = arith.constant 0 : i32
    %c0_i32_0 = arith.constant 0 : i32
    %c0_i32_1 = arith.constant 0 : i32
    %c0_i32_2 = arith.constant 0 : i32
    return %arg1, %c0_i32, %c0_i32_0, %c0_i32_1 : i32, i32, i32, i32
  }
  func.func @transform_1(%arg0: i32, %arg1: i32) -> (i32, i32, i32) {
    %c0_i32 = arith.constant 0 : i32
    %c0_i32_0 = arith.constant 0 : i32
    %c0_i32_1 = arith.constant 0 : i32
    return %c0_i32, %c0_i32_0, %arg0 : i32, i32, i32
  }
  func.func @transform_2(%arg0: i32, %arg1: i32) -> (i32, i32) {
    %c0_i32 = arith.constant 0 : i32
    %c0_i32_0 = arith.constant 0 : i32
    return %c0_i32, %arg0 : i32, i32
  }
  func.func @transform_3(%arg0: i32, %arg1: i32) -> (i32, i32, i32) {
    %c0_i32 = arith.constant 0 : i32
    %c0_i32_0 = arith.constant 0 : i32
    return %arg1, %c0_i32, %arg0 : i32, i32, i32
  }
}

</mosaic_0001>

<bundles_post_ra>
// kernel: tpu_custom_call.1
= control target key start
LH: loop header
LB: loop body
LE: loop exit
PB: predicated region body
PF: predicated region fallthrough
CT: control target
= control target key end

     0   :  { %8 = vsyncpa [#allocation3], 0  ;;  %s833_s0 = inlined_call_operand.vmem [shape: bf16[2,2,9,4], index: 0, kind: input, shape index: {}]   ;;  %s834_s1 = inlined_call_operand.vmem [shape: bf16[3,4,128], index: 1, kind: input, shape index: {}]   ;;  %s835_s2 = inlined_call_operand.vmem [shape: f32[1,128], index: 2, kind: input, shape index: {}]   ;;  %s836_s3 = inlined_call_operand.hbm [shape: f32[2,8,128], index: 3, kind: output, shape index: {}]  }
   0x1   :  { %10 = vsyncpa [#allocation3 + $0x1], 0  ;;  %s713_s12 = smov 0   ;;  %s715_s13 = smov 0  }
   0x2   :  { %s717_s14 = smov 0   ;;  %s719_s15 = smov 0  }
   0x3   :  { %s721_s16 = smov 0   ;;  %s723_s17 = smov 0  }
   0x4 LB: > { %s505_s18 = sadd.s32 4294967295, %s688_s17   ;;  %s506_s19 = sadd.s32 4294967294, %s688_s17   ;;  %s688_s17 = sphi %s723_s17, %s16_s17   ;;  %s684_s16 = sphi %s721_s16, %s843_s16   ;;  %s680_s15 = sphi %s719_s15, %s842_s15   ;;  %s676_s14 = sphi %s717_s14, %s841_s14   ;;  %s672_s13 = sphi %s715_s13, %s840_s13   ;;  %s668_s12 = sphi %s713_s12, %s839_s12  }
   0x5   : > { %s25_s20 = sadd.s32 1, %s684_s16  ;;  %s115_s21 = sadd.s32 1, %s676_s14 }
   0x6   : > { %p26_p0 = scmp.ge.s32.totalorder %s25_s20, 2  ;;  %p125_p1 = scmp.ne.s32.totalorder %s676_s14, %s672_s13 }
   0x7   : > { %p126_p2 = scmp.eq.s32.totalorder %s505_s18, 1  ;;  %p131_p3 = scmp.ne.s32.totalorder %s672_s13, %s668_s12 }
   0x8   : > { %s845_s20 = smov (%p26_p0, %s25_s20), 0  ;;  %p132_p5 = scmp.eq.s32.totalorder %s506_s19, 1 }
   0x9   : > { %p753_p4 = por %p126_p2, %p125_p1  ;;  %s110_s23 = ssub.s32 %s684_s16, %s845_s20 }
   0xa   : > { %p511_p6 = scmp.ge.s32.totalorder %s688_s17, 1  ;;  %p113_p7 = scmp.eq.s32.totalorder %s110_s23, 0 }
   0xb   : > { %p760_p8 = por %p132_p5, %p131_p3  ;;  %p171_p9 = scmp.lt.s32.totalorder %s688_s17, 3 }
   0xc   : > { %s766_s25 = scalar_select %p113_p7, %s676_s14, %s115_s21  }
   0xd   : > { %p172_p10 = pnand %p511_p6, %p171_p9 }
   0xe   : > { %p202_p11 = scmp.lt.s32.totalorder (!%p172_p10), %s680_s15, 1  ;;  %s199_s18 = sand.u32 (!%p172_p10), 1, %s672_s13  }
   0xf   : > { %175 = sbr.rel (%p172_p10) target bundleno = 280 (0x118), region = 32  ;;  %s512_s19 = sshll.u32 (!%p172_p10), %s199_s18, 3 }
  0x10   : > { %s524_s21 = sshll.u32 (!%p172_p10), %s680_s15, 7  ;;  %s201_s23 = scalar_lea.vmem (!%p172_p10), [#allocation2], %s512_s19 }
  0x11   : > { %s410_s26 = sshll.u32 (!%p172_p10), %s201_s23, 4  ;;  %s408_s29 = scalar_lea.hbm (!%p172_p10), %s836_s3, %s524_s21  ;;  %s411_s26 = int_to_ptr.vmem [resolvable:$true] %s410_s26 }
  0x12   : > { %s692_s5 = smov (!%p172_p10), [#allocation2]  }
  0x13   : > { %s616_s6 = sshll.u32 (!%p172_p10), %s692_s5, 4  ;;  %s617_s6 = int_to_ptr.vmem [resolvable:$false] %s616_s6 }
  0x14   : > { %v515_v0 = vld [vmem:[%s834_s1 + $0x4] sm:$0x3]  ;;  %vm236_vm0 = vcmask 1041408   ;;  %v217_v1 = vld [vmem:[%s834_s1] sm:$0x3]  ;;  %v690_v2 = vmov 0.0   ;;  %p619_p1 = scmp.lt.s32.totalorder %s411_s26, %s617_s6 }
  0x15   : > { %534 = vmatprep.subr.bf16.mxu0 %v690_v2  ;;  %v238_v3 = vsel %vm236_vm0, %v515_v0, 0  ;;  %540 = vmatprep.subr.bf16.mxu1 %v690_v2  ;;  %v284_v4 = vsel %vm236_vm0, %v217_v1, 0  ;;  %vm691_vm1 = vmmov 0   ;;  %s203_s30 = scalar_select %p202_p11, %s680_s15, 1  ;;  %vm232_vm2 = vcmask 31744  }
  0x16   : > { %535 = vmatpush3.bf16.msra.mxu0 %v238_v3  ;;  %541 = vmatpush3.bf16.msra.mxu1 %v284_v4  ;;  %v520_v10 = vld [vmem:[%s834_s1 + $0x2] sm:$0x3]  ;;  %v522_v25 = vld [vmem:[%s835_s2] ss:$0 sm:$0xff]  ;;  %s618_s15 = scalar_lea.vmem %s617_s6, 256 }
  0x17   : > { %536 = vmatprep.mubr.msk.bf16.mxu0 %vm691_vm1, %v690_v2  ;;  %542 = vmatprep.mubr.msk.bf16.mxu1 %vm691_vm1, %v690_v2  ;;  %s527_s4 = sshll.u32 %s203_s30, 4  ;;  %v334_v13 = vsel %vm236_vm0, %v520_v10, 0  ;;  %s396_s30 = scalar_lea.sflag [#allocation3], %s199_s18 }
  0x18   : > { %546 = vmatprep.subr.bf16.mxu0 %v690_v2  ;;  %s206_s7 = scalar_lea.vmem %s833_s0, %s527_s4  ;;  %s612_s4 = scalar_lea.vmem %s411_s26, 128 }
  0x19   : > { %v215_v5 = vld [vmem:[%s206_s7] sm:$0xf]  ;;  %v216_v6 = vld [vmem:[%s206_s7 + $0x4] sm:$0x1]  ;;  %v519_v14 = vld [vmem:[%s206_s7 + $0x8] sm:$0xf]  ;;  %p613_p12 = scmp.ne.s32.totalorder %s411_s26, %s612_s4  ;;  %p620_p2 = scmp.lt.s32.totalorder %s618_s15, %s612_s4 }
  0x1a   : > { %v516_v7 = vcombine.low %v215_v5, %v216_v6  ;;  %543 = vmatmul.mubr.msk.bf16.vlgmr.msra.gmra.mxu1 %vm232_vm2, %v215_v5 }
  0x1b   : > { %p614_p13 = pnand %p613_p12, %p753_p4  ;;  %p621_p3 = por %p620_p2, %p619_p1 }
  0x1c   : > { %v226_v8 = vshrl.u32 %v516_v7, 16  ;;  %v228_v9 = vshll.u32 %v516_v7, 16 }
  0x1d   : > { %p615_p0 = pneg %p614_p13 }
  0x1e   : > { %v230_v11 = vrot.slane %v228_v9, 1 }
  0x1f   : > { %p622_p5 = pnand %p621_p3, %p615_p0 }
  0x20   : > { %v231_v12 = vor.u32 %v230_v11, %v226_v8 }
  0x22   : > { %537 = vmatmul.mubr.msk.bf16.vlgmr.msra.gmra.mxu0 %vm232_vm2, %v231_v12 }
  0x23   : > { %547 = vmatpush3.bf16.msra.mxu0 %v334_v13  ;;  %548 = vmatprep.mubr.msk.bf16.mxu0 %vm691_vm1, %v690_v2 }
  0x2a   : > { %549 = vmatmul.mubr.msk.bf16.vlgmr.msra.gmra.mxu0 %vm232_vm2, %v519_v14 }
  0xda   : > { %v320_v15 = vpop.f32.mrf.mxu1 }
  0xdc   : > { %v544_v16 = vpop.f32.mrf.mxu1 }
  0xde   : > { %v323_v17 = vpop.f32.mrf.mxu1 }
  0xe0   : > { %v545_v18 = vpop.f32.mrf.mxu1 }
  0xe2   : > { %v274_v19 = vpop.f32.mrf.mxu0 }
  0xe3   : > { %v321_v23 = vadd.f32 %v320_v15, %v274_v19 }
  0xe4   : > { %v538_v20 = vpop.f32.mrf.mxu0 }
  0xe6   : > { %v277_v21 = vpop.f32.mrf.mxu0 }
  0xe8   : > { %v539_v22 = vpop.f32.mrf.mxu0 }
  0xea   : > { %v370_v24 = vpop.f32.mrf.mxu0 }
  0xeb   : > { %v376_v26 = vadd.f32 %v370_v24, %v321_v23 }
  0xec   : > { %v550_v27 = vpop.f32.mrf.mxu0 }
  0xed   : > { %v384_v28 = vadd.f32 %v522_v25, %v376_v26 }
  0xee   : > { %v373_v29 = vpop.f32.mrf.mxu0 }
  0xef   : > { %v385_v30 = vmul.f32 %v384_v28, %v384_v28  ;;  %v389_v37 = vmul.f32 0.5, %v384_v28 }
  0xf0   : > { %v551_v31 = vpop.f32.mrf.mxu0 }
  0xf1   : > { %v386_v32 = vmul.f32 0.044715, %v385_v30 }
  0xf3   : > { %v387_v33 = vadd.f32 1.0, %v386_v32 }
  0xf5   : > { %v388_v34 = vmul.f32 %v387_v33, %v384_v28 }
  0xf7   : > { %v390_v35 = vmul.f32 1.2533141, %v388_v34 }
  0xf9   : > { %610 = vtanh.f32 %v390_v35 }
 0x106   : > { %v611_v36 = vpop.eup %610 }
 0x107   : > { %v392_v38 = vadd.f32 1.0, %v611_v36 }
 0x109   : > { %v393_v39 = vmul.f32 %v392_v38, %v389_v37 }
 0x10b   : > { %394 = vst [vmem:[%s201_s23] sm:$0xff] %v393_v39 }
 0x10c   : > { %625 = shalt.err (!%p622_p5)
}
 0x10d   : > { %s626_s7 = scalar_lea.hbm %s408_s29, 128  ;;  %s630_s10 = scalar_lea.hbm %s836_s3, 256 }
 0x10e   : > { %p627_p6 = scmp.ne.s32.totalorder %s408_s29, %s626_s7  ;;  %p631_p10 = scmp.lt.s32.totalorder %s408_s29, %s836_s3 }
 0x10f   : > { %p632_p11 = scmp.lt.s32.totalorder %s630_s10, %s626_s7 }
 0x110   : > { %p628_p7 = pnand %p627_p6, %p753_p4 }
 0x111   : > { %p633_p12 = por %p632_p11, %p631_p10 }
 0x112   : > { %p629_p9 = pneg %p628_p7 }
 0x114   : > { %p634_p13 = pnand %p633_p12, %p629_p9 }
 0x116   : > { %637 = shalt.err (!%p634_p13)
}
 0x117   : > { %552 = dma.vmem_to_hbm [thread:$0]  (%p753_p4), %s411_s26, 128, %s408_s29, %s396_s30  }
 0x118 PF: > { %p558_p0 = scmp.ge.s32.totalorder %s688_s17, 2  ;;  %s422_s19 = sand.u32 1, %s668_s12  }
 0x119   : > { %s423_s21 = scalar_lea.sflag [#allocation3], %s422_s19 }
 0x11a   : > { %p555_p1 = pnand %p558_p0, %p760_p8 }
 0x11c   : > { %p556_p2 = pneg %p555_p1 }
 0x11e   : > { %663 = dma.done.wait (%p556_p2), %s423_s21, 128  }
 0x11f   : > { %665 = vsyncadd (%p556_p2), %s423_s21, 4294967168  ;;  %s16_s17 = sadd.s32 1, %s688_s17   ;;  %s839_s12 = smov %s672_s13 }
 0x120   : > { %p13_p3 = scmp.ge.s32.totalorder %s16_s17, 4   ;;  %s840_s13 = smov %s676_s14 }
 0x121   : > { %s841_s14 = smov %s766_s25  ;;  %s842_s15 = smov %s684_s16 }
 0x122   : > { %s843_s16 = smov %s845_s20  ;;  %15 = sbr.rel (!%p13_p3) target bundleno = 4 (0x4), region = 76 }
 0x127   :  { %428 = vsyncpa [#allocation3], 1 }
 0x128   :  { %430 = vsyncpa [#allocation3 + $0x1], 1 }

</bundles_post_ra>
